<compile_context>
chip_gen: v7x
topology: tpu7x:2x2x1
jax: 0.10.0
libtpu: 0.0.40
codegen_flags: <defaults>
</compile_context>

<pallas_src>
import functools

import jax
import jax.numpy as jnp
import numpy as np
from jax import lax
from jax.experimental import pallas as pl
from jax.experimental.pallas import tpu as pltpu

ITEM_NUM = 127              # config['item_num']
VOCAB = 1 + ITEM_NUM        # 128 -> exactly one lane width
MAX_LEN = 8                 # config['max_len']
LANES = 128                 # TPU lane width
SUB = 8                     # sublanes per vreg / rows processed per inner chunk
TILE_ROWS_MAX = 512         # (512, 128) int32 = 256 KiB per buffer (v5e/v6e/v7x safe)


def _hist_kernel(seq_ref, hist_ref, *, tile_rows, unroll):
    """Accumulate per-(vocab, lane-position) partial counts of item ids.

    seq_ref : (tile_rows, 128) int32 tile of the flattened sequence (pad value = -1)
    hist_ref: (VOCAB, 128) int32 accumulator block, resident across grid axis 1.
              hist_ref[v, l] = #elements equal to v seen at lane position l.
    """
    @pl.when(pl.program_id(1) == 0)
    def _():
        hist_ref[...] = jnp.zeros_like(hist_ref)

    # Constant: vocab id along sublanes, replicated along lanes (hoisted out of the loop).
    vocab_ids = lax.broadcasted_iota(jnp.int32, (VOCAB, LANES), 0)

    def chunk_body(c, acc):
        r = pl.multiple_of(c * SUB, SUB)
        chunk = seq_ref[pl.ds(r, SUB), :]              # (8, 128): one dense vreg load
        for j in range(SUB):                           # static unroll over sublanes
            row = chunk[j:j + 1, :]                    # (1, 128) ids
            # Sublane-broadcast compare (cheap direction) -> per-lane one-hot over vocab.
            acc = acc + (row == vocab_ids).astype(jnp.int32)
        return acc

    acc = lax.fori_loop(0, tile_rows // SUB, chunk_body,
                        jnp.zeros((VOCAB, LANES), jnp.int32), unroll=unroll)
    # Single dense, unmasked (128, 128) accumulate per grid step.
    hist_ref[...] += acc


def session_pop_histogram(item_seq):
    """Per-item counts over the whole (flattened) item_seq tensor. Stays on device.

    Ids are assumed to lie in [0, VOCAB); anything else (including the -1 padding the
    wrapper adds) is silently dropped, matching the module's vocab-bounded usage.
    Counts accumulate in int32 (overflow only past 2^31 occurrences of one item).
    """
    flat = jnp.ravel(item_seq).astype(jnp.int32)
    n = flat.shape[0]

    n_rows = -(-n // LANES)                              # ceil: 128-wide rows needed
    if n_rows <= TILE_ROWS_MAX:
        tile_rows = max(SUB, -(-n_rows // SUB) * SUB)    # single tile, single core
        num_cores, tiles_per_core = 1, 1
    else:
        tile_rows = TILE_ROWS_MAX
        num_tiles = -(-n_rows // tile_rows)
        num_cores = 2 if num_tiles >= 2 else 1           # 2-way "parallel" split (helps v7x)
        tiles_per_core = -(-num_tiles // num_cores)
    rows_pad = num_cores * tiles_per_core * tile_rows
    n_pad = rows_pad * LANES

    flat = jnp.pad(flat, (0, n_pad - n), constant_values=-1)   # -1 = out-of-vocab pad
    seq2d = flat.reshape(rows_pad, LANES)                       # lane-dense layout

    trips = tile_rows // SUB
    unroll = True if trips <= 4 else 1                   # body is already ~400 vector ops

    kernel = functools.partial(_hist_kernel, tile_rows=tile_rows, unroll=unroll)
    parts = pl.pallas_call(
        kernel,
        out_shape=jax.ShapeDtypeStruct((num_cores * VOCAB, LANES), jnp.int32),
        grid_spec=pltpu.PrefetchScalarGridSpec(
            num_scalar_prefetch=0,
            grid=(num_cores, tiles_per_core),
            in_specs=[pl.BlockSpec((tile_rows, LANES),
                                   lambda c, t: (c * tiles_per_core + t, 0))],
            out_specs=pl.BlockSpec((VOCAB, LANES), lambda c, t: (c, 0)),
        ),
        compiler_params=pltpu.CompilerParams(
            dimension_semantics=("parallel", "arbitrary")),
    )(seq2d)

    # Tiny wrapper-side reduction over cores and lane positions (fused by XLA).
    return parts.reshape(num_cores, VOCAB, LANES).sum(axis=(0, 2)).astype(jnp.int32)


@jax.jit
def session_pop_forward(item_seq):
    """Mirrors SessionPop.forward: idx, cnt = torch.unique(item_seq, return_counts=True).

    Returns fixed-shape device arrays:
      idx: (VOCAB,) sorted unique ids first, sentinel VOCAB padding after
      cnt: (VOCAB,) counts aligned with idx (0 at sentinel positions)
      num_unique: () number of valid entries
    """
    # TODO(synk): torch.unique's variable-length output has no Pallas/JAX equivalent
    # (dynamic shapes); results are returned padded to VOCAB with num_unique alongside.
    hist = session_pop_histogram(item_seq)
    present = hist > 0
    num_unique = jnp.sum(present.astype(jnp.int32))
    iota = jnp.arange(VOCAB, dtype=jnp.int32)
    idx = jnp.sort(jnp.where(present, iota, jnp.int32(VOCAB)))   # valid ids first, sorted
    hist_ext = jnp.concatenate([hist, jnp.zeros((1,), jnp.int32)])  # sentinel slot -> 0
    cnt = hist_ext[idx]
    return idx, cnt, num_unique


@jax.jit
def session_pop_fit_step(item_cnt_ref, item_seq):
    """fit() accumulation: item_cnt_ref[idx] += cnt, done directly from the histogram."""
    return item_cnt_ref + session_pop_histogram(item_seq).astype(item_cnt_ref.dtype)


if __name__ == "__main__":
    key = jax.random.PRNGKey(0)

    # --- SessionPop-sized forward (batch=2, max_len=8) -------------------------------
    batch, seq_len = 2, MAX_LEN
    item_cnt_ref = jnp.zeros((VOCAB,), dtype=jnp.float32)        # self.item_cnt_ref

    item_seq = jax.random.randint(key, (batch, seq_len), 0, VOCAB, dtype=jnp.int32)

    idx, cnt, num_unique = session_pop_forward(item_seq)
    jax.block_until_ready((idx, cnt, num_unique))

    # Reference check against numpy's unique (same semantics as torch.unique).
    k = int(num_unique)
    ref_idx, ref_cnt = np.unique(np.asarray(item_seq), return_counts=True)
    assert k == ref_idx.shape[0], "num_unique mismatch"
    assert np.array_equal(np.asarray(idx)[:k], ref_idx.astype(np.int32)), "idx mismatch"
    assert np.array_equal(np.asarray(cnt)[:k], ref_cnt.astype(np.int32)), "cnt mismatch"

    # fit() accumulation step -- no unique extraction or host sync needed.
    item_cnt_ref = session_pop_fit_step(item_cnt_ref, item_seq)
    jax.block_until_ready(item_cnt_ref)
    assert np.allclose(np.asarray(item_cnt_ref)[ref_idx], ref_cnt.astype(np.float32)), \
        "fit accumulation mismatch"

    # --- Larger input: exercises the multi-tile / 2-way-parallel grid path -----------
    big_seq = jax.random.randint(jax.random.PRNGKey(1), (2100, 130), 0, VOCAB,
                                 dtype=jnp.int32)
    big_hist = jax.jit(session_pop_histogram)(big_seq)
    jax.block_until_ready(big_hist)
    ref_hist = np.bincount(np.asarray(big_seq).ravel(), minlength=VOCAB)
    assert np.array_equal(np.asarray(big_hist), ref_hist.astype(np.int32)), \
        "histogram mismatch on tiled path"

    print("KERNEL_OK")
</pallas_src>

<mosaic_0001>
module attributes {stable_mosaic.version = 11 : i64} {
  func.func @_hist_kernel(%arg0: i32, %arg1: i32, %arg2: memref<8x128xi32, #tpu.memory_space<vmem>>, %arg3: memref<128x128xi32, #tpu.memory_space<vmem>>) attributes {dimension_semantics = [#tpu.dimension_semantics<parallel>, #tpu.dimension_semantics<arbitrary>], iteration_bounds = array<i64: 1, 1>, scalar_prefetch = 0 : i64, scratch_operands = 0 : i64, tpu.core_type = #tpu.core_type<tc>, window_params = [{transform_indices = @transform_0, window_bounds = array<i64: 8, 128>}, {transform_indices = @transform_1, window_bounds = array<i64: 128, 128>}]} {
    %c0_i32 = arith.constant 0 : i32
    %0 = arith.cmpi eq, %arg1, %c0_i32 : i32
    %1 = arith.extui %0 : i1 to i32
    %c0_i32_0 = arith.constant 0 : i32
    %2 = arith.cmpi ne, %1, %c0_i32_0 : i32
    scf.if %2 {
      %c0_i32_7 = arith.constant 0 : i32
      %52 = vector.broadcast %c0_i32_7 : i32 to vector<128x128xi32>
      %c0_8 = arith.constant 0 : index
      %c0_9 = arith.constant 0 : index
      %53 = vector.load %arg3[%c0_8, %c0_9] : memref<128x128xi32, #tpu.memory_space<vmem>>, vector<128x128xi32>
      tpu.vector_store %arg3[%c0_8, %c0_9], %52 {strides = array<i32>} : memref<128x128xi32, #tpu.memory_space<vmem>>, vector<128x128xi32>,
    } else {
    }
    %3 = tpu.iota {dimensions = array<i32: 0>} : vector<128x128xi32>
    %c0_i32_1 = arith.constant 0 : i32
    %4 = vector.broadcast %c0_i32_1 : i32 to vector<128x128xi32>
    %c0_i32_2 = arith.constant 0 : i32
    %c8_i32 = arith.constant 8 : i32
    %5 = arith.muli %c0_i32_2, %c8_i32 : i32
    %6 = tpu.assume_multiple %5, 8 : i32
    %7 = arith.index_cast %6 : i32 to index
    %c0 = arith.constant 0 : index
    %8 = vector.load %arg2[%7, %c0] : memref<8x128xi32, #tpu.memory_space<vmem>>, vector<8x128xi32>
    %9 = vector.extract_strided_slice %8 {offsets = [0, 0], sizes = [1, 128], strides = [1, 1]} : vector<8x128xi32> to vector<1x128xi32>
    %10 = vector.broadcast %9 : vector<1x128xi32> to vector<128x128xi32>
    %11 = arith.cmpi eq, %10, %3 : vector<128x128xi32>
    %12 = arith.extui %11 : vector<128x128xi1> to vector<128x128xi32>
    %13 = arith.addi %4, %12 : vector<128x128xi32>
    %14 = vector.extract_strided_slice %8 {offsets = [1, 0], sizes = [1, 128], strides = [1, 1]} : vector<8x128xi32> to vector<1x128xi32>
    %15 = vector.broadcast %14 : vector<1x128xi32> to vector<128x128xi32>
    %16 = arith.cmpi eq, %15, %3 : vector<128x128xi32>
    %17 = arith.extui %16 : vector<128x128xi1> to vector<128x128xi32>
    %18 = arith.addi %13, %17 : vector<128x128xi32>
    %19 = vector.extract_strided_slice %8 {offsets = [2, 0], sizes = [1, 128], strides = [1, 1]} : vector<8x128xi32> to vector<1x128xi32>
    %20 = vector.broadcast %19 : vector<1x128xi32> to vector<128x128xi32>
    %21 = arith.cmpi eq, %20, %3 : vector<128x128xi32>
    %22 = arith.extui %21 : vector<128x128xi1> to vector<128x128xi32>
    %23 = arith.addi %18, %22 : vector<128x128xi32>
    %24 = vector.extract_strided_slice %8 {offsets = [3, 0], sizes = [1, 128], strides = [1, 1]} : vector<8x128xi32> to vector<1x128xi32>
    %25 = vector.broadcast %24 : vector<1x128xi32> to vector<128x128xi32>
    %26 = arith.cmpi eq, %25, %3 : vector<128x128xi32>
    %27 = arith.extui %26 : vector<128x128xi1> to vector<128x128xi32>
    %28 = arith.addi %23, %27 : vector<128x128xi32>
    %29 = vector.extract_strided_slice %8 {offsets = [4, 0], sizes = [1, 128], strides = [1, 1]} : vector<8x128xi32> to vector<1x128xi32>
    %30 = vector.broadcast %29 : vector<1x128xi32> to vector<128x128xi32>
    %31 = arith.cmpi eq, %30, %3 : vector<128x128xi32>
    %32 = arith.extui %31 : vector<128x128xi1> to vector<128x128xi32>
    %33 = arith.addi %28, %32 : vector<128x128xi32>
    %34 = vector.extract_strided_slice %8 {offsets = [5, 0], sizes = [1, 128], strides = [1, 1]} : vector<8x128xi32> to vector<1x128xi32>
    %35 = vector.broadcast %34 : vector<1x128xi32> to vector<128x128xi32>
    %36 = arith.cmpi eq, %35, %3 : vector<128x128xi32>
    %37 = arith.extui %36 : vector<128x128xi1> to vector<128x128xi32>
    %38 = arith.addi %33, %37 : vector<128x128xi32>
    %39 = vector.extract_strided_slice %8 {offsets = [6, 0], sizes = [1, 128], strides = [1, 1]} : vector<8x128xi32> to vector<1x128xi32>
    %40 = vector.broadcast %39 : vector<1x128xi32> to vector<128x128xi32>
    %41 = arith.cmpi eq, %40, %3 : vector<128x128xi32>
    %42 = arith.extui %41 : vector<128x128xi1> to vector<128x128xi32>
    %43 = arith.addi %38, %42 : vector<128x128xi32>
    %44 = vector.extract_strided_slice %8 {offsets = [7, 0], sizes = [1, 128], strides = [1, 1]} : vector<8x128xi32> to vector<1x128xi32>
    %45 = vector.broadcast %44 : vector<1x128xi32> to vector<128x128xi32>
    %46 = arith.cmpi eq, %45, %3 : vector<128x128xi32>
    %47 = arith.extui %46 : vector<128x128xi1> to vector<128x128xi32>
    %48 = arith.addi %43, %47 : vector<128x128xi32>
    %c1_i32 = arith.constant 1 : i32
    %c0_3 = arith.constant 0 : index
    %c0_4 = arith.constant 0 : index
    %49 = vector.load %arg3[%c0_3, %c0_4] : memref<128x128xi32, #tpu.memory_space<vmem>>, vector<128x128xi32>
    %50 = arith.addi %49, %48 : vector<128x128xi32>
    %c0_5 = arith.constant 0 : index
    %c0_6 = arith.constant 0 : index
    %51 = vector.load %arg3[%c0_5, %c0_6] : memref<128x128xi32, #tpu.memory_space<vmem>>, vector<128x128xi32>
    tpu.vector_store %arg3[%c0_5, %c0_6], %50 {strides = array<i32>} : memref<128x128xi32, #tpu.memory_space<vmem>>, vector<128x128xi32>,
    return
  }
  func.func @transform_0(%arg0: i32, %arg1: i32) -> (i32, i32) {
    %c1_i32 = arith.constant 1 : i32
    %0 = arith.muli %arg0, %c1_i32 : i32
    %1 = arith.addi %0, %arg1 : i32
    %c0_i32 = arith.constant 0 : i32
    %c0_i32_0 = arith.constant 0 : i32
    return %1, %c0_i32 : i32, i32
  }
  func.func @transform_1(%arg0: i32, %arg1: i32) -> (i32, i32) {
    %c0_i32 = arith.constant 0 : i32
    %c0_i32_0 = arith.constant 0 : i32
    return %arg0, %c0_i32 : i32, i32
  }
}

</mosaic_0001>

<bundles_post_ra>
// kernel: session_pop_forward.1
= control target key start
LH: loop header
LB: loop body
LE: loop exit
PB: predicated region body
PF: predicated region fallthrough
CT: control target
= control target key end

     0   :  { %v45_v0 = vlaneseq  ;;  %v522_v19 = vmov 0   ;;  %s1012_s0 = inlined_call_operand.vmem [shape: s32[8,128], index: 0, kind: input, shape index: {}]   ;;  %s1013_s1 = inlined_call_operand.vmem [shape: s32[128,128], index: 1, kind: output, shape index: {}]  }
   0x1   :  { %v62_v2 = vld [vmem:[%s1012_s0] sm:$0xff] }
   0x2   :  { %v533_v1 = vshrl.u32 %v45_v0, 7 }
   0x4   :  { %v65_v3 = vsub.s32 0, %v533_v1  ;;  %v101_v4 = vsub.s32 1, %v533_v1  ;;  %v153_v5 = vsub.s32 2, %v533_v1  ;;  %v205_v6 = vsub.s32 3, %v533_v1 }
   0x5   :  { %v257_v7 = vsub.s32 4, %v533_v1  ;;  %v309_v8 = vsub.s32 5, %v533_v1  ;;  %v361_v9 = vsub.s32 6, %v533_v1  ;;  %v413_v10 = vsub.s32 7, %v533_v1 }
   0x6   :  { %v546_v11 = vrot.slane %v62_v2, %v65_v3  ;;  %v548_v12 = vrot.slane %v62_v2, %v101_v4  ;;  %v550_v13 = vrot.slane %v62_v2, %v153_v5  ;;  %v552_v14 = vrot.slane %v62_v2, %v205_v6 }
   0x7   :  { %v554_v15 = vrot.slane %v62_v2, %v257_v7  ;;  %v556_v16 = vrot.slane %v62_v2, %v309_v8  ;;  %v558_v17 = vrot.slane %v62_v2, %v361_v9  ;;  %v560_v18 = vrot.slane %v62_v2, %v413_v10 }
   0x8   :  { %vm67_vm0 = vcmp.eq.s32.totalorder %v546_v11, %v533_v1  ;;  %vm103_vm1 = vcmp.eq.s32.totalorder %v548_v12, %v533_v1  ;;  %vm155_vm2 = vcmp.eq.s32.totalorder %v550_v13, %v533_v1  ;;  %vm207_vm3 = vcmp.eq.s32.totalorder %v552_v14, %v533_v1 }
   0x9   :  { %v83_v20 = vsel %vm67_vm0, 1, %v522_v19  ;;  %v119_v21 = vsel %vm103_vm1, 1, %v522_v19  ;;  %v171_v22 = vsel %vm155_vm2, 1, %v522_v19  ;;  %vm259_vm4 = vcmp.eq.s32.totalorder %v554_v15, %v533_v1 }
   0xa   :  { %v135_v23 = vadd.s32 %v119_v21, %v83_v20  ;;  %vm311_vm5 = vcmp.eq.s32.totalorder %v556_v16, %v533_v1  ;;  %vm363_vm6 = vcmp.eq.s32.totalorder %v558_v17, %v533_v1  ;;  %v223_v24 = vsel %vm207_vm3, 1, %v522_v19 }
   0xb   :  { %v275_v25 = vsel %vm259_vm4, 1, %v522_v19  ;;  %v327_v26 = vsel %vm311_vm5, 1, %v522_v19  ;;  %vm415_vm7 = vcmp.eq.s32.totalorder %v560_v18, %v533_v1  ;;  %v379_v28 = vsel %vm363_vm6, 1, %v522_v19 }
   0xc   :  { %v187_v27 = vadd.s32 %v171_v22, %v135_v23  ;;  %v431_v29 = vsel %vm415_vm7, 1, %v522_v19  ;;  %v47_v30 = vadd.s32 8, %v533_v1  ;;  %v588_v31 = vadd.s32 16, %v533_v1 }
   0xd   :  { %v591_v32 = vadd.s32 24, %v533_v1  ;;  %v594_v33 = vadd.s32 32, %v533_v1  ;;  %v597_v34 = vadd.s32 40, %v533_v1  ;;  %v608_v41 = vadd.s32 48, %v533_v1 }
   0xe   :  { %v239_v35 = vadd.s32 %v223_v24, %v187_v27  ;;  %vm68_vm8 = vcmp.eq.s32.totalorder %v546_v11, %v47_v30  ;;  %vm104_vm9 = vcmp.eq.s32.totalorder %v548_v12, %v47_v30  ;;  %vm156_vm10 = vcmp.eq.s32.totalorder %v550_v13, %v47_v30 }
   0xf   :  { %v84_v36 = vsel %vm68_vm8, 1, %v522_v19  ;;  %v120_v37 = vsel %vm104_vm9, 1, %v522_v19  ;;  %v172_v38 = vsel %vm156_vm10, 1, %v522_v19  ;;  %vm208_vm11 = vcmp.eq.s32.totalorder %v552_v14, %v47_v30 }
  0x10   :  { %v291_v39 = vadd.s32 %v275_v25, %v239_v35  ;;  %v136_v40 = vadd.s32 %v120_v37, %v84_v36  ;;  %vm260_vm12 = vcmp.eq.s32.totalorder %v554_v15, %v47_v30  ;;  %v224_v42 = vsel %vm208_vm11, 1, %v522_v19 }
  0x11   :  { %v276_v43 = vsel %vm260_vm12, 1, %v522_v19  ;;  %vm312_vm13 = vcmp.eq.s32.totalorder %v556_v16, %v47_v30  ;;  %vm364_vm14 = vcmp.eq.s32.totalorder %v558_v17, %v47_v30  ;;  %vm416_vm15 = vcmp.eq.s32.totalorder %v560_v18, %v47_v30 }
  0x12   :  { %v343_v44 = vadd.s32 %v327_v26, %v291_v39  ;;  %v188_v45 = vadd.s32 %v172_v38, %v136_v40  ;;  %v328_v46 = vsel %vm312_vm13, 1, %v522_v19  ;;  %v380_v47 = vsel %vm364_vm14, 1, %v522_v19 }
  0x13   :  { %vm69_vm0 = vcmp.eq.s32.totalorder %v546_v11, %v588_v31  ;;  %vm105_vm1 = vcmp.eq.s32.totalorder %v548_v12, %v588_v31  ;;  %vm157_vm2 = vcmp.eq.s32.totalorder %v550_v13, %v588_v31  ;;  %vm209_vm3 = vcmp.eq.s32.totalorder %v552_v14, %v588_v31 }
  0x14   :  { %v395_v48 = vadd.s32 %v379_v28, %v343_v44  ;;  %v240_v49 = vadd.s32 %v224_v42, %v188_v45  ;;  %v85_v50 = vsel %vm69_vm0, 1, %v522_v19  ;;  %v121_v51 = vsel %vm105_vm1, 1, %v522_v19 }
  0x15   :  { %v137_v52 = vadd.s32 %v121_v51, %v85_v50  ;;  %v173_v53 = vsel %vm157_vm2, 1, %v522_v19  ;;  %vm261_vm4 = vcmp.eq.s32.totalorder %v554_v15, %v588_v31  ;;  %v432_v56 = vsel %vm416_vm15, 1, %v522_v19 }
  0x16   :  { %v447_v54 = vadd.s32 %v431_v29, %v395_v48  ;;  %v292_v55 = vadd.s32 %v276_v43, %v240_v49  ;;  %v225_v57 = vsel %vm209_vm3, 1, %v522_v19  ;;  %v277_v59 = vsel %vm261_vm4, 1, %v522_v19 }
  0x17   :  { %v189_v58 = vadd.s32 %v173_v53, %v137_v52  ;;  %vm313_vm5 = vcmp.eq.s32.totalorder %v556_v16, %v588_v31  ;;  %vm365_vm6 = vcmp.eq.s32.totalorder %v558_v17, %v588_v31  ;;  %vm417_vm7 = vcmp.eq.s32.totalorder %v560_v18, %v588_v31 }
  0x18   :  { %v344_v60 = vadd.s32 %v328_v46, %v292_v55  ;;  %v329_v61 = vsel %vm313_vm5, 1, %v522_v19  ;;  %v381_v63 = vsel %vm365_vm6, 1, %v522_v19  ;;  %vm70_vm8 = vcmp.eq.s32.totalorder %v546_v11, %v591_v32  ;;  %495 = vst [vmem:[%s1013_s1] sm:$0xff] %v447_v54 }
  0x19   :  { %v241_v62 = vadd.s32 %v225_v57, %v189_v58  ;;  %vm106_vm9 = vcmp.eq.s32.totalorder %v548_v12, %v591_v32  ;;  %v86_v2 = vsel %vm70_vm8, 1, %v522_v19  ;;  %vm158_vm10 = vcmp.eq.s32.totalorder %v550_v13, %v591_v32 }
  0x1a   :  { %v396_v0 = vadd.s32 %v380_v47, %v344_v60  ;;  %v122_v3 = vsel %vm106_vm9, 1, %v522_v19  ;;  %v174_v6 = vsel %vm158_vm10, 1, %v522_v19  ;;  %vm210_vm11 = vcmp.eq.s32.totalorder %v552_v14, %v591_v32 }
  0x1b   :  { %v293_v4 = vadd.s32 %v277_v59, %v241_v62  ;;  %v138_v5 = vadd.s32 %v122_v3, %v86_v2  ;;  %v226_v8 = vsel %vm210_vm11, 1, %v522_v19  ;;  %vm262_vm12 = vcmp.eq.s32.totalorder %v554_v15, %v591_v32 }
  0x1c   :  { %v448_v7 = vadd.s32 %v432_v56, %v396_v0  ;;  %vm314_vm13 = vcmp.eq.s32.totalorder %v556_v16, %v591_v32  ;;  %v433_v10 = vsel %vm417_vm7, 1, %v522_v19  ;;  %v278_v21 = vsel %vm262_vm12, 1, %v522_v19 }
  0x1d   :  { %v345_v9 = vadd.s32 %v329_v61, %v293_v4  ;;  %v190_v20 = vadd.s32 %v174_v6, %v138_v5  ;;  %v330_v22 = vsel %vm314_vm13, 1, %v522_v19  ;;  %vm366_vm14 = vcmp.eq.s32.totalorder %v558_v17, %v591_v32 }
  0x1e   :  { %vm71_vm15 = vcmp.eq.s32.totalorder %v546_v11, %v594_v33  ;;  %v382_v25 = vsel %vm366_vm14, 1, %v522_v19  ;;  %vm418_vm0 = vcmp.eq.s32.totalorder %v560_v18, %v591_v32  ;;  %496 = vst [vmem:[%s1013_s1 + $0x8] sm:$0xff] %v448_v7  ;;  %vm107_vm1 = vcmp.eq.s32.totalorder %v548_v12, %v594_v33 }
  0x1f   :  { %v397_v23 = vadd.s32 %v381_v63, %v345_v9  ;;  %v242_v24 = vadd.s32 %v226_v8, %v190_v20  ;;  %v87_v26 = vsel %vm71_vm15, 1, %v522_v19  ;;  %vm159_vm2 = vcmp.eq.s32.totalorder %v550_v13, %v594_v33 }
  0x20   :  { %vm211_vm3 = vcmp.eq.s32.totalorder %v552_v14, %v594_v33  ;;  %v123_v29 = vsel %vm107_vm1, 1, %v522_v19  ;;  %v175_v30 = vsel %vm159_vm2, 1, %v522_v19  ;;  %v434_v31 = vsel %vm418_vm0, 1, %v522_v19 }
  0x21   :  { %v449_v27 = vadd.s32 %v433_v10, %v397_v23  ;;  %v294_v28 = vadd.s32 %v278_v21, %v242_v24  ;;  %v139_v32 = vadd.s32 %v123_v29, %v87_v26  ;;  %vm263_vm4 = vcmp.eq.s32.totalorder %v554_v15, %v594_v33 }
  0x22   :  { %vm315_vm5 = vcmp.eq.s32.totalorder %v556_v16, %v594_v33  ;;  %v227_v36 = vsel %vm211_vm3, 1, %v522_v19  ;;  %v279_v37 = vsel %vm263_vm4, 1, %v522_v19  ;;  %vm367_vm6 = vcmp.eq.s32.totalorder %v558_v17, %v594_v33 }
  0x23   :  { %v346_v35 = vadd.s32 %v330_v22, %v294_v28  ;;  %v191_v38 = vadd.s32 %v175_v30, %v139_v32  ;;  %vm419_vm7 = vcmp.eq.s32.totalorder %v560_v18, %v594_v33  ;;  %vm72_vm8 = vcmp.eq.s32.totalorder %v546_v11, %v597_v34  ;;  %497 = vst [vmem:[%s1013_s1 + $0x10] sm:$0xff] %v449_v27 }
  0x24   :  { %v331_v40 = vsel %vm315_vm5, 1, %v522_v19  ;;  %v383_v42 = vsel %vm367_vm6, 1, %v522_v19  ;;  %v88_v43 = vsel %vm72_vm8, 1, %v522_v19  ;;  %vm108_vm9 = vcmp.eq.s32.totalorder %v548_v12, %v597_v34 }
  0x25   :  { %v398_v39 = vadd.s32 %v382_v25, %v346_v35  ;;  %v243_v44 = vadd.s32 %v227_v36, %v191_v38  ;;  %vm160_vm10 = vcmp.eq.s32.totalorder %v550_v13, %v597_v34  ;;  %vm212_vm11 = vcmp.eq.s32.totalorder %v552_v14, %v597_v34 }
  0x26   :  { %v435_v45 = vsel %vm419_vm7, 1, %v522_v19  ;;  %v124_v46 = vsel %vm108_vm9, 1, %v522_v19  ;;  %v176_v47 = vsel %vm160_vm10, 1, %v522_v19  ;;  %vm264_vm12 = vcmp.eq.s32.totalorder %v554_v15, %v597_v34 }
  0x27   :  { %v450_v33 = vadd.s32 %v434_v31, %v398_v39  ;;  %v295_v48 = vadd.s32 %v279_v37, %v243_v44  ;;  %v140_v49 = vadd.s32 %v124_v46, %v88_v43  ;;  %vm316_vm13 = vcmp.eq.s32.totalorder %v556_v16, %v597_v34 }
  0x28   :  { %v228_v50 = vsel %vm212_vm11, 1, %v522_v19  ;;  %v280_v51 = vsel %vm264_vm12, 1, %v522_v19  ;;  %vm368_vm14 = vcmp.eq.s32.totalorder %v558_v17, %v597_v34  ;;  %v332_v54 = vsel %vm316_vm13, 1, %v522_v19 }
  0x29   :  { %v347_v52 = vadd.s32 %v331_v40, %v295_v48  ;;  %v192_v53 = vadd.s32 %v176_v47, %v140_v49  ;;  %v384_v55 = vsel %vm368_vm14, 1, %v522_v19  ;;  %498 = vst [vmem:[%s1013_s1 + $0x18] sm:$0xff] %v450_v33  ;;  %vm420_vm15 = vcmp.eq.s32.totalorder %v560_v18, %v597_v34 }
  0x2a   :  { %vm73_vm0 = vcmp.eq.s32.totalorder %v546_v11, %v608_v41  ;;  %vm109_vm1 = vcmp.eq.s32.totalorder %v548_v12, %v608_v41  ;;  %vm161_vm2 = vcmp.eq.s32.totalorder %v550_v13, %v608_v41  ;;  %vm213_vm3 = vcmp.eq.s32.totalorder %v552_v14, %v608_v41 }
  0x2b   :  { %v399_v56 = vadd.s32 %v383_v42, %v347_v52  ;;  %v244_v57 = vadd.s32 %v228_v50, %v192_v53  ;;  %v89_v58 = vsel %vm73_vm0, 1, %v522_v19  ;;  %v125_v59 = vsel %vm109_vm1, 1, %v522_v19 }
  0x2c   :  { %v141_v60 = vadd.s32 %v125_v59, %v89_v58  ;;  %v177_v61 = vsel %vm161_vm2, 1, %v522_v19  ;;  %vm265_vm4 = vcmp.eq.s32.totalorder %v554_v15, %v608_v41  ;;  %v436_v63 = vsel %vm420_vm15, 1, %v522_v19 }
  0x2d   :  { %v451_v34 = vadd.s32 %v435_v45, %v399_v56  ;;  %v296_v62 = vadd.s32 %v280_v51, %v244_v57  ;;  %v229_v0 = vsel %vm213_vm3, 1, %v522_v19  ;;  %vm317_vm5 = vcmp.eq.s32.totalorder %v556_v16, %v608_v41 }
  0x2e   :  { %v193_v2 = vadd.s32 %v177_v61, %v141_v60  ;;  %vm369_vm6 = vcmp.eq.s32.totalorder %v558_v17, %v608_v41  ;;  %vm421_vm7 = vcmp.eq.s32.totalorder %v560_v18, %v608_v41  ;;  %v281_v4 = vsel %vm265_vm4, 1, %v522_v19 }
  0x2f   :  { %v348_v3 = vadd.s32 %v332_v54, %v296_v62  ;;  %v333_v5 = vsel %vm317_vm5, 1, %v522_v19  ;;  %v385_v7 = vsel %vm369_vm6, 1, %v522_v19  ;;  %v437_v8 = vsel %vm421_vm7, 1, %v522_v19  ;;  %499 = vst [vmem:[%s1013_s1 + $0x20] sm:$0xff] %v451_v34 }
  0x30   :  { %v245_v6 = vadd.s32 %v229_v0, %v193_v2  ;;  %v53_v9 = vadd.s32 56, %v533_v1  ;;  %v54_v20 = vadd.s32 64, %v533_v1  ;;  %v759_v41 = vadd.s32 72, %v533_v1 }
  0x31   :  { %v400_v10 = vadd.s32 %v384_v55, %v348_v3  ;;  %v762_v21 = vadd.s32 80, %v533_v1  ;;  %v775_v30 = vadd.s32 88, %v533_v1 }
  0x32   :  { %v297_v22 = vadd.s32 %v281_v4, %v245_v6  ;;  %vm74_vm8 = vcmp.eq.s32.totalorder %v546_v11, %v53_v9  ;;  %vm110_vm9 = vcmp.eq.s32.totalorder %v548_v12, %v53_v9  ;;  %vm162_vm10 = vcmp.eq.s32.totalorder %v550_v13, %v53_v9 }
  0x33   :  { %v452_v23 = vadd.s32 %v436_v63, %v400_v10  ;;  %v90_v24 = vsel %vm74_vm8, 1, %v522_v19  ;;  %v126_v25 = vsel %vm110_vm9, 1, %v522_v19  ;;  %v178_v26 = vsel %vm162_vm10, 1, %v522_v19 }
  0x34   :  { %v349_v27 = vadd.s32 %v333_v5, %v297_v22  ;;  %v142_v28 = vadd.s32 %v126_v25, %v90_v24  ;;  %vm214_vm11 = vcmp.eq.s32.totalorder %v552_v14, %v53_v9  ;;  %vm266_vm12 = vcmp.eq.s32.totalorder %v554_v15, %v53_v9 }
  0x35   :  { %v230_v29 = vsel %vm214_vm11, 1, %v522_v19  ;;  %vm318_vm13 = vcmp.eq.s32.totalorder %v556_v16, %v53_v9  ;;  %v282_v35 = vsel %vm266_vm12, 1, %v522_v19  ;;  %vm370_vm14 = vcmp.eq.s32.totalorder %v558_v17, %v53_v9  ;;  %500 = vst [vmem:[%s1013_s1 + $0x28] sm:$0xff] %v452_v23 }
  0x36   :  { %v401_v31 = vadd.s32 %v385_v7, %v349_v27  ;;  %v194_v32 = vadd.s32 %v178_v26, %v142_v28  ;;  %v334_v36 = vsel %vm318_vm13, 1, %v522_v19  ;;  %v386_v37 = vsel %vm370_vm14, 1, %v522_v19 }
  0x37   :  { %vm75_vm15 = vcmp.eq.s32.totalorder %v546_v11, %v54_v20  ;;  %vm111_vm0 = vcmp.eq.s32.totalorder %v548_v12, %v54_v20  ;;  %vm422_vm1 = vcmp.eq.s32.totalorder %v560_v18, %v53_v9  ;;  %vm163_vm2 = vcmp.eq.s32.totalorder %v550_v13, %v54_v20 }
  0x38   :  { %v453_v38 = vadd.s32 %v437_v8, %v401_v31  ;;  %v246_v39 = vadd.s32 %v230_v29, %v194_v32  ;;  %v91_v40 = vsel %vm75_vm15, 1, %v522_v19  ;;  %v127_v42 = vsel %vm111_vm0, 1, %v522_v19 }
  0x39   :  { %vm215_vm3 = vcmp.eq.s32.totalorder %v552_v14, %v54_v20  ;;  %vm267_vm4 = vcmp.eq.s32.totalorder %v554_v15, %v54_v20  ;;  %v143_v44 = vadd.s32 %v127_v42, %v91_v40  ;;  %v179_v33 = vsel %vm163_vm2, 1, %v522_v19 }
  0x3a   :  { %v298_v43 = vadd.s32 %v282_v35, %v246_v39  ;;  %v438_v45 = vsel %vm422_vm1, 1, %v522_v19  ;;  %v231_v46 = vsel %vm215_vm3, 1, %v522_v19  ;;  %vm319_vm5 = vcmp.eq.s32.totalorder %v556_v16, %v54_v20  ;;  %501 = vst [vmem:[%s1013_s1 + $0x30] sm:$0xff] %v453_v38 }
  0x3b   :  { %vm371_vm6 = vcmp.eq.s32.totalorder %v558_v17, %v54_v20  ;;  %v195_v48 = vadd.s32 %v179_v33, %v143_v44  ;;  %v283_v49 = vsel %vm267_vm4, 1, %v522_v19  ;;  %v335_v50 = vsel %vm319_vm5, 1, %v522_v19 }
  0x3c   :  { %v350_v47 = vadd.s32 %v334_v36, %v298_v43  ;;  %vm423_vm7 = vcmp.eq.s32.totalorder %v560_v18, %v54_v20  ;;  %vm76_vm8 = vcmp.eq.s32.totalorder %v546_v11, %v759_v41  ;;  %vm112_vm9 = vcmp.eq.s32.totalorder %v548_v12, %v759_v41 }
  0x3d   :  { %vm164_vm10 = vcmp.eq.s32.totalorder %v550_v13, %v759_v41  ;;  %v247_v52 = vadd.s32 %v231_v46, %v195_v48  ;;  %v387_v53 = vsel %vm371_vm6, 1, %v522_v19  ;;  %v92_v54 = vsel %vm76_vm8, 1, %v522_v19 }
  0x3e   :  { %v402_v51 = vadd.s32 %v386_v37, %v350_v47  ;;  %v128_v55 = vsel %vm112_vm9, 1, %v522_v19  ;;  %v180_v56 = vsel %vm164_vm10, 1, %v522_v19  ;;  %vm216_vm11 = vcmp.eq.s32.totalorder %v552_v14, %v759_v41 }
  0x3f   :  { %vm268_vm12 = vcmp.eq.s32.totalorder %v554_v15, %v759_v41  ;;  %v299_v58 = vadd.s32 %v283_v49, %v247_v52  ;;  %v439_v59 = vsel %vm423_vm7, 1, %v522_v19  ;;  %v144_v60 = vadd.s32 %v128_v55, %v92_v54 }
  0x40   :  { %v454_v57 = vadd.s32 %v438_v45, %v402_v51  ;;  %v232_v61 = vsel %vm216_vm11, 1, %v522_v19  ;;  %v284_v34 = vsel %vm268_vm12, 1, %v522_v19  ;;  %vm320_vm13 = vcmp.eq.s32.totalorder %v556_v16, %v759_v41 }
  0x41   :  { %vm372_vm14 = vcmp.eq.s32.totalorder %v558_v17, %v759_v41  ;;  %v351_v62 = vadd.s32 %v335_v50, %v299_v58  ;;  %v196_v63 = vadd.s32 %v180_v56, %v144_v60  ;;  %vm424_vm15 = vcmp.eq.s32.totalorder %v560_v18, %v759_v41 }
  0x42   :  { %v336_v0 = vsel %vm320_vm13, 1, %v522_v19  ;;  %v388_v2 = vsel %vm372_vm14, 1, %v522_v19  ;;  %vm77_vm0 = vcmp.eq.s32.totalorder %v546_v11, %v762_v21  ;;  %vm113_vm1 = vcmp.eq.s32.totalorder %v548_v12, %v762_v21  ;;  %502 = vst [vmem:[%s1013_s1 + $0x38] sm:$0xff] %v454_v57 }
  0x43   :  { %v403_v3 = vadd.s32 %v387_v53, %v351_v62  ;;  %v248_v4 = vadd.s32 %v232_v61, %v196_v63  ;;  %v93_v5 = vsel %vm77_vm0, 1, %v522_v19  ;;  %v129_v6 = vsel %vm113_vm1, 1, %v522_v19 }
  0x44   :  { %v145_v7 = vadd.s32 %v129_v6, %v93_v5  ;;  %vm165_vm2 = vcmp.eq.s32.totalorder %v550_v13, %v762_v21  ;;  %vm217_vm3 = vcmp.eq.s32.totalorder %v552_v14, %v762_v21  ;;  %vm269_vm4 = vcmp.eq.s32.totalorder %v554_v15, %v762_v21 }
  0x45   :  { %v455_v8 = vadd.s32 %v439_v59, %v403_v3  ;;  %v300_v9 = vadd.s32 %v284_v34, %v248_v4  ;;  %v181_v10 = vsel %vm165_vm2, 1, %v522_v19  ;;  %v233_v20 = vsel %vm217_vm3, 1, %v522_v19 }
  0x46   :  { %v440_v22 = vsel %vm424_vm15, 1, %v522_v19  ;;  %v197_v23 = vadd.s32 %v181_v10, %v145_v7  ;;  %vm321_vm5 = vcmp.eq.s32.totalorder %v556_v16, %v762_v21  ;;  %vm373_vm6 = vcmp.eq.s32.totalorder %v558_v17, %v762_v21 }
  0x47   :  { %v352_v24 = vadd.s32 %v336_v0, %v300_v9  ;;  %v285_v25 = vsel %vm269_vm4, 1, %v522_v19  ;;  %v337_v26 = vsel %vm321_vm5, 1, %v522_v19  ;;  %v389_v28 = vsel %vm373_vm6, 1, %v522_v19  ;;  %503 = vst [vmem:[%s1013_s1 + $0x40] sm:$0xff] %v455_v8 }
  0x48   :  { %v249_v27 = vadd.s32 %v233_v20, %v197_v23  ;;  %vm78_vm7 = vcmp.eq.s32.totalorder %v546_v11, %v775_v30  ;;  %vm114_vm8 = vcmp.eq.s32.totalorder %v548_v12, %v775_v30  ;;  %vm425_vm9 = vcmp.eq.s32.totalorder %v560_v18, %v762_v21 }
  0x49   :  { %v404_v41 = vadd.s32 %v388_v2, %v352_v24  ;;  %v94_v29 = vsel %vm78_vm7, 1, %v522_v19  ;;  %v130_v31 = vsel %vm114_vm8, 1, %v522_v19  ;;  %vm166_vm10 = vcmp.eq.s32.totalorder %v550_v13, %v775_v30 }
  0x4a   :  { %v301_v32 = vadd.s32 %v285_v25, %v249_v27  ;;  %v146_v35 = vadd.s32 %v130_v31, %v94_v29  ;;  %vm218_vm11 = vcmp.eq.s32.totalorder %v552_v14, %v775_v30  ;;  %v182_v37 = vsel %vm166_vm10, 1, %v522_v19 }
  0x4b   :  { %v456_v36 = vadd.s32 %v440_v22, %v404_v41  ;;  %v234_v38 = vsel %vm218_vm11, 1, %v522_v19  ;;  %vm270_vm12 = vcmp.eq.s32.totalorder %v554_v15, %v775_v30  ;;  %v441_v39 = vsel %vm425_vm9, 1, %v522_v19 }
  0x4c   :  { %v353_v21 = vadd.s32 %v337_v26, %v301_v32  ;;  %v198_v40 = vadd.s32 %v182_v37, %v146_v35  ;;  %vm322_vm13 = vcmp.eq.s32.totalorder %v556_v16, %v775_v30  ;;  %v286_v42 = vsel %vm270_vm12, 1, %v522_v19 }
  0x4d   :  { %vm374_vm14 = vcmp.eq.s32.totalorder %v558_v17, %v775_v30  ;;  %vm426_vm15 = vcmp.eq.s32.totalorder %v560_v18, %v775_v30  ;;  %504 = vst [vmem:[%s1013_s1 + $0x48] sm:$0xff] %v456_v36  ;;  %v338_v33 = vsel %vm322_vm13, 1, %v522_v19  ;;  %v58_v46 = vadd.s32 96, %v533_v1 }
  0x4e   :  { %v405_v43 = vadd.s32 %v389_v28, %v353_v21  ;;  %v250_v44 = vadd.s32 %v234_v38, %v198_v40  ;;  %v390_v45 = vsel %vm374_vm14, 1, %v522_v19  ;;  %v442_v49 = vsel %vm426_vm15, 1, %v522_v19 }
  0x4f   :  { %v891_v50 = vadd.s32 104, %v533_v1  ;;  %vm79_vm0 = vcmp.eq.s32.totalorder %v546_v11, %v58_v46  ;;  %vm115_vm1 = vcmp.eq.s32.totalorder %v548_v12, %v58_v46  ;;  %vm167_vm2 = vcmp.eq.s32.totalorder %v550_v13, %v58_v46 }
  0x50   :  { %v457_v47 = vadd.s32 %v441_v39, %v405_v43  ;;  %v302_v48 = vadd.s32 %v286_v42, %v250_v44  ;;  %vm219_vm3 = vcmp.eq.s32.totalorder %v552_v14, %v58_v46  ;;  %v95_v51 = vsel %vm79_vm0, 1, %v522_v19 }
  0x51   :  { %v131_v52 = vsel %vm115_vm1, 1, %v522_v19  ;;  %v183_v54 = vsel %vm167_vm2, 1, %v522_v19  ;;  %vm271_vm4 = vcmp.eq.s32.totalorder %v554_v15, %v58_v46  ;;  %v902_v55 = vadd.s32 112, %v533_v1 }
  0x52   :  { %v354_v30 = vadd.s32 %v338_v33, %v302_v48  ;;  %v147_v53 = vadd.s32 %v131_v52, %v95_v51  ;;  %505 = vst [vmem:[%s1013_s1 + $0x50] sm:$0xff] %v457_v47  ;;  %v235_v57 = vsel %vm219_vm3, 1, %v522_v19  ;;  %vm323_vm5 = vcmp.eq.s32.totalorder %v556_v16, %v58_v46 }
  0x53   :  { %v910_v58 = vadd.s32 120, %v533_v1  ;;  %v287_v60 = vsel %vm271_vm4, 1, %v522_v19  ;;  %v339_v61 = vsel %vm323_vm5, 1, %v522_v19  ;;  %vm375_vm6 = vcmp.eq.s32.totalorder %v558_v17, %v58_v46 }
  0x54   :  { %v406_v56 = vadd.s32 %v390_v45, %v354_v30  ;;  %v199_v59 = vadd.s32 %v183_v54, %v147_v53  ;;  %vm427_vm7 = vcmp.eq.s32.totalorder %v560_v18, %v58_v46  ;;  %vm80_vm8 = vcmp.eq.s32.totalorder %v546_v11, %v891_v50 }
  0x55   :  { %vm116_vm9 = vcmp.eq.s32.totalorder %v548_v12, %v891_v50  ;;  %v96_v1 = vsel %vm80_vm8, 1, %v522_v19  ;;  %vm168_vm10 = vcmp.eq.s32.totalorder %v550_v13, %v891_v50  ;;  %vm220_vm11 = vcmp.eq.s32.totalorder %v552_v14, %v891_v50 }
  0x56   :  { %v458_v34 = vadd.s32 %v442_v49, %v406_v56  ;;  %v251_v62 = vadd.s32 %v235_v57, %v199_v59  ;;  %v132_v63 = vsel %vm116_vm9, 1, %v522_v19  ;;  %v184_v2 = vsel %vm168_vm10, 1, %v522_v19 }
  0x57   :  { %v148_v0 = vadd.s32 %v132_v63, %v96_v1  ;;  %v236_v4 = vsel %vm220_vm11, 1, %v522_v19  ;;  %vm272_vm12 = vcmp.eq.s32.totalorder %v554_v15, %v891_v50  ;;  %vm324_vm13 = vcmp.eq.s32.totalorder %v556_v16, %v891_v50 }
  0x58   :  { %v303_v3 = vadd.s32 %v287_v60, %v251_v62  ;;  %506 = vst [vmem:[%s1013_s1 + $0x58] sm:$0xff] %v458_v34  ;;  %v391_v5 = vsel %vm375_vm6, 1, %v522_v19  ;;  %v443_v6 = vsel %vm427_vm7, 1, %v522_v19  ;;  %v288_v8 = vsel %vm272_vm12, 1, %v522_v19 }
  0x59   :  { %v200_v7 = vadd.s32 %v184_v2, %v148_v0  ;;  %v340_v10 = vsel %vm324_vm13, 1, %v522_v19  ;;  %vm376_vm14 = vcmp.eq.s32.totalorder %v558_v17, %v891_v50  ;;  %vm81_vm15 = vcmp.eq.s32.totalorder %v546_v11, %v902_v55 }
  0x5a   :  { %v355_v9 = vadd.s32 %v339_v61, %v303_v3  ;;  %vm428_vm0 = vcmp.eq.s32.totalorder %v560_v18, %v891_v50  ;;  %v97_v22 = vsel %vm81_vm15, 1, %v522_v19  ;;  %vm117_vm1 = vcmp.eq.s32.totalorder %v548_v12, %v902_v55 }
  0x5b   :  { %v252_v20 = vadd.s32 %v236_v4, %v200_v7  ;;  %v133_v24 = vsel %vm117_vm1, 1, %v522_v19  ;;  %vm169_vm2 = vcmp.eq.s32.totalorder %v550_v13, %v902_v55  ;;  %vm221_vm3 = vcmp.eq.s32.totalorder %v552_v14, %v902_v55 }
  0x5c   :  { %v407_v23 = vadd.s32 %v391_v5, %v355_v9  ;;  %v392_v26 = vsel %vm376_vm14, 1, %v522_v19  ;;  %v149_v27 = vadd.s32 %v133_v24, %v97_v22  ;;  %v185_v28 = vsel %vm169_vm2, 1, %v522_v19 }
  0x5d   :  { %v304_v25 = vadd.s32 %v288_v8, %v252_v20  ;;  %v237_v29 = vsel %vm221_vm3, 1, %v522_v19  ;;  %vm273_vm4 = vcmp.eq.s32.totalorder %v554_v15, %v902_v55  ;;  %vm325_vm5 = vcmp.eq.s32.totalorder %v556_v16, %v902_v55 }
  0x5e   :  { %v459_v41 = vadd.s32 %v443_v6, %v407_v23  ;;  %v444_v32 = vsel %vm428_vm0, 1, %v522_v19  ;;  %v201_v35 = vadd.s32 %v185_v28, %v149_v27  ;;  %v289_v36 = vsel %vm273_vm4, 1, %v522_v19 }
  0x5f   :  { %v356_v31 = vadd.s32 %v340_v10, %v304_v25  ;;  %vm377_vm6 = vcmp.eq.s32.totalorder %v558_v17, %v902_v55  ;;  %vm82_vm7 = vcmp.eq.s32.totalorder %v546_v11, %v910_v58  ;;  %v341_v21 = vsel %vm325_vm5, 1, %v522_v19 }
  0x60   :  { %v253_v38 = vadd.s32 %v237_v29, %v201_v35  ;;  %v98_v39 = vsel %vm82_vm7, 1, %v522_v19  ;;  %507 = vst [vmem:[%s1013_s1 + $0x60] sm:$0xff] %v459_v41  ;;  %vm429_vm8 = vcmp.eq.s32.totalorder %v560_v18, %v902_v55  ;;  %vm118_vm9 = vcmp.eq.s32.totalorder %v548_v12, %v910_v58 }
  0x61   :  { %v408_v37 = vadd.s32 %v392_v26, %v356_v31  ;;  %vm170_vm10 = vcmp.eq.s32.totalorder %v550_v13, %v910_v58  ;;  %vm222_vm11 = vcmp.eq.s32.totalorder %v552_v14, %v910_v58  ;;  %v134_v42 = vsel %vm118_vm9, 1, %v522_v19 }
  0x62   :  { %v305_v40 = vadd.s32 %v289_v36, %v253_v38  ;;  %v186_v43 = vsel %vm170_vm10, 1, %v522_v19  ;;  %v393_v44 = vsel %vm377_vm6, 1, %v522_v19  ;;  %v150_v33 = vadd.s32 %v134_v42, %v98_v39 }
  0x63   :  { %v460_v11 = vadd.s32 %v444_v32, %v408_v37  ;;  %vm274_vm12 = vcmp.eq.s32.totalorder %v554_v15, %v910_v58  ;;  %v238_v12 = vsel %vm222_vm11, 1, %v522_v19  ;;  %v445_v13 = vsel %vm429_vm8, 1, %v522_v19 }
  0x64   :  { %v357_v45 = vadd.s32 %v341_v21, %v305_v40  ;;  %v202_v46 = vadd.s32 %v186_v43, %v150_v33  ;;  %vm326_vm13 = vcmp.eq.s32.totalorder %v556_v16, %v910_v58  ;;  %v290_v47 = vsel %vm274_vm12, 1, %v522_v19 }
  0x65   :  { %508 = vst [vmem:[%s1013_s1 + $0x68] sm:$0xff] %v460_v11  ;;  %vm378_vm14 = vcmp.eq.s32.totalorder %v558_v17, %v910_v58  ;;  %v342_v49 = vsel %vm326_vm13, 1, %v522_v19  ;;  %vm430_vm15 = vcmp.eq.s32.totalorder %v560_v18, %v910_v58 }
  0x66   :  { %v409_v14 = vadd.s32 %v393_v44, %v357_v45  ;;  %v254_v48 = vadd.s32 %v238_v12, %v202_v46  ;;  %v394_v16 = vsel %vm378_vm14, 1, %v522_v19  ;;  %v446_v51 = vsel %vm430_vm15, 1, %v522_v19 }
  0x68   :  { %v461_v15 = vadd.s32 %v445_v13, %v409_v14  ;;  %v306_v50 = vadd.s32 %v290_v47, %v254_v48 }
  0x6a   :  { %v358_v30 = vadd.s32 %v342_v49, %v306_v50  ;;  %509 = vst [vmem:[%s1013_s1 + $0x70] sm:$0xff] %v461_v15 }
  0x6c   :  { %v410_v52 = vadd.s32 %v394_v16, %v358_v30 }
  0x6e   :  { %v462_v53 = vadd.s32 %v446_v51, %v410_v52 }
  0x70   :  { %510 = vst [vmem:[%s1013_s1 + $0x78] sm:$0xff] %v462_v53 }

</bundles_post_ra>
